<compile_context>
chip_gen: v7x
topology: tpu7x:2x2x1
jax: 0.10.0
libtpu: 0.0.40
codegen_flags: <defaults>
</compile_context>

<pallas_src>
import functools
import math

import jax
import jax.numpy as jnp
from jax.experimental import pallas as pl
from jax.experimental.pallas import tpu as pltpu


# Per-buffer block byte budget.  Each pallas_call streams one input block and
# one output block, each double-buffered => ~4x this amount of VMEM in flight,
# comfortably inside v5e's 16 MiB scoped default and v7x's 64 MiB physical VMEM.
_MAX_BLOCK_BYTES = 3 * 1024 * 1024
# Explicit scoped-VMEM budget (safe headroom on v5e / v6e / v7x).
_VMEM_LIMIT_BYTES = 32 * 1024 * 1024


def _sublane_multiple(dtype):
    # Rows per vreg sublane group: f32 -> 8, bf16 -> 16, int8/fp8 -> 32.
    return {4: 8, 2: 16, 1: 32}.get(jnp.dtype(dtype).itemsize, 8)


# -----------------------------------------------------------------------------
# Kernels
# -----------------------------------------------------------------------------

def _ln_channels_first_kernel(x_ref, w_ref, b_ref, o_ref, *, eps):
    # x_ref: (TB, C, TL)  -- C on sublanes, flattened spatial tile on lanes.
    # w_ref: (C, 1), b_ref: (C, 1); o_ref: (TB, C, TL).
    x = x_ref[...].astype(jnp.float32)
    u = jnp.mean(x, axis=1, keepdims=True)              # sublane reduce
    xc = x - u
    var = jnp.mean(xc * xc, axis=1, keepdims=True)      # biased variance (matches module)
    inv = jax.lax.rsqrt(var + eps)                      # EUP (free slot)
    w = w_ref[...][None, :, :]                          # (1, C, 1)
    b = b_ref[...][None, :, :]
    o_ref[...] = (xc * inv * w + b).astype(o_ref.dtype)


def _ln_channels_last_plain_kernel(x_ref, w_ref, b_ref, o_ref, *, eps):
    # x_ref: (TM, C) -- rows on sublanes, normalized dim C on lanes.
    x = x_ref[...].astype(jnp.float32)
    u = jnp.mean(x, axis=-1, keepdims=True)             # lane reduce (XLU)
    xc = x - u
    var = jnp.mean(xc * xc, axis=-1, keepdims=True)
    inv = jax.lax.rsqrt(var + eps)
    o_ref[...] = (xc * inv * w_ref[...] + b_ref[...]).astype(o_ref.dtype)


def _ln_channels_last_packed_kernel(x_ref, w_ref, b_ref, seg_ref, o_ref, *,
                                    eps, inv_c):
    # Lane-dense path for C < 128: each kernel row holds g = 128//C logical rows.
    # x_ref: (TM, G) with G = g*C (= 128); w_ref/b_ref: (1, G) tiled affine;
    # seg_ref: (G, 128) one-hot segment matrix, seg[j, j//C] = 1.
    x = x_ref[...].astype(jnp.float32)
    seg = seg_ref[...]
    hi = jax.lax.Precision.HIGHEST
    # Per-segment mean via segment-sum matmul on the (otherwise idle) MXU.
    u = jnp.dot(x, seg, preferred_element_type=jnp.float32,
                precision=hi) * inv_c                                   # (TM, 128)
    # Broadcast per-segment stats back onto the lanes (contract segment axis).
    u_b = jax.lax.dot_general(u, seg, (((1,), (1,)), ((), ())),
                              preferred_element_type=jnp.float32,
                              precision=hi)                             # (TM, G)
    xc = x - u_b
    var = jnp.dot(xc * xc, seg, preferred_element_type=jnp.float32,
                  precision=hi) * inv_c
    inv = jax.lax.rsqrt(var + eps)                                      # EUP
    inv_b = jax.lax.dot_general(inv, seg, (((1,), (1,)), ((), ())),
                                preferred_element_type=jnp.float32,
                                precision=hi)
    o_ref[...] = (xc * inv_b * w_ref[...] + b_ref[...]).astype(o_ref.dtype)


# -----------------------------------------------------------------------------
# Wrappers
# -----------------------------------------------------------------------------

def layer_norm_channels_first(x, weight, bias, eps=1e-6):
    """x: (N, C, H, W); weight, bias: (C,). Normalize over the channel dim."""
    N, C, H, W = x.shape
    HW = H * W
    x3 = x.reshape(N, C, HW)                 # free contiguous reshape
    itemsize = x3.dtype.itemsize

    # Spatial (lane) tile: byte budget is a function of C so 2-in + 2-out
    # double-buffered blocks always fit scoped VMEM on every generation.
    if HW >= 128:
        hw_128 = (HW // 128) * 128
        tl_budget = max(128, (_MAX_BLOCK_BYTES // (C * itemsize)) // 128 * 128)
        TL = min(hw_128, tl_budget)
    else:
        TL = HW
    bytes_per_b = C * TL * itemsize
    TB = max(1, min(N, _MAX_BLOCK_BYTES // max(bytes_per_b, 1)))

    # v7x megacore: ensure >= 2 grid steps whenever the input can be split.
    while pl.cdiv(N, TB) * pl.cdiv(HW, TL) < 2:
        if TB > 1:
            TB = (TB + 1) // 2
        elif TL >= 256:
            TL = ((TL // 2) // 128) * 128
        else:
            break

    grid = (pl.cdiv(N, TB), pl.cdiv(HW, TL))

    w2 = weight.reshape(C, 1).astype(jnp.float32)
    b2 = bias.reshape(C, 1).astype(jnp.float32)

    cost = pl.CostEstimate(
        flops=int(7 * N * C * HW),
        transcendentals=int(N * HW),
        bytes_accessed=int(2 * x.size * itemsize + 8 * C),
    )

    out = pl.pallas_call(
        functools.partial(_ln_channels_first_kernel, eps=float(eps)),
        out_shape=jax.ShapeDtypeStruct((N, C, HW), x.dtype),
        grid_spec=pltpu.PrefetchScalarGridSpec(
            num_scalar_prefetch=0,
            grid=grid,
            in_specs=[
                pl.BlockSpec((TB, C, TL), lambda b, l: (b, 0, l)),
                pl.BlockSpec((C, 1), lambda b, l: (0, 0)),   # resident in VMEM
                pl.BlockSpec((C, 1), lambda b, l: (0, 0)),
            ],
            out_specs=pl.BlockSpec((TB, C, TL), lambda b, l: (b, 0, l)),
        ),
        compiler_params=pltpu.CompilerParams(
            dimension_semantics=("parallel", "parallel"),
            vmem_limit_bytes=_VMEM_LIMIT_BYTES),
        cost_estimate=cost,
    )(x3, w2, b2)
    return out.reshape(N, C, H, W)


def _layer_norm_channels_last_plain(x, weight, bias, eps, M, C):
    x2 = x.reshape(M, C)                     # free contiguous reshape
    itemsize = x2.dtype.itemsize
    sub = _sublane_multiple(x2.dtype)

    tm_budget = max(sub, (_MAX_BLOCK_BYTES // (C * itemsize)) // sub * sub)
    if M >= sub:
        TM = max(sub, min((M // sub) * sub, tm_budget))
    else:
        TM = M
    # v7x megacore: ensure >= 2 grid steps whenever the input can be split.
    while pl.cdiv(M, TM) < 2 and TM > sub:
        TM = max(sub, ((TM // 2) // sub) * sub)

    grid = (pl.cdiv(M, TM),)

    w2 = weight.reshape(1, C).astype(jnp.float32)
    b2 = bias.reshape(1, C).astype(jnp.float32)

    cost = pl.CostEstimate(
        flops=int(7 * M * C),
        transcendentals=int(M),
        bytes_accessed=int(2 * M * C * itemsize + 8 * C),
    )

    out = pl.pallas_call(
        functools.partial(_ln_channels_last_plain_kernel, eps=float(eps)),
        out_shape=jax.ShapeDtypeStruct((M, C), x.dtype),
        grid_spec=pltpu.PrefetchScalarGridSpec(
            num_scalar_prefetch=0,
            grid=grid,
            in_specs=[
                pl.BlockSpec((TM, C), lambda i: (i, 0)),
                pl.BlockSpec((1, C), lambda i: (0, 0)),
                pl.BlockSpec((1, C), lambda i: (0, 0)),
            ],
            out_specs=pl.BlockSpec((TM, C), lambda i: (i, 0)),
        ),
        compiler_params=pltpu.CompilerParams(
            dimension_semantics=("parallel",),
            vmem_limit_bytes=_VMEM_LIMIT_BYTES),
        cost_estimate=cost,
    )(x2, w2, b2)
    return out.reshape(x.shape)


def _layer_norm_channels_last_packed(x, weight, bias, eps, M, C, g):
    G = g * C                                # == 128 (lane-dense)
    Mp = M // g
    x2 = x.reshape(Mp, G)                    # free contiguous reshape
    itemsize = x2.dtype.itemsize
    sub = _sublane_multiple(x2.dtype)

    tm_budget = max(sub, (_MAX_BLOCK_BYTES // (G * itemsize)) // sub * sub)
    if Mp >= sub:
        TM = max(sub, min((Mp // sub) * sub, tm_budget))
    else:
        TM = Mp
    # v7x megacore: ensure >= 2 grid steps whenever the input can be split.
    while pl.cdiv(Mp, TM) < 2 and TM > sub:
        TM = max(sub, ((TM // 2) // sub) * sub)

    grid = (pl.cdiv(Mp, TM),)

    # One-hot segment matrix: seg[j, s] = 1 iff lane j belongs to logical row s.
    # Columns padded to 128 so all matmul operands / results stay lane-dense.
    col = jnp.arange(128)[None, :]
    row_seg = (jnp.arange(G) // C)[:, None]
    seg = (col == row_seg).astype(jnp.float32)                  # (G, 128)

    w_t = jnp.tile(weight.reshape(1, C).astype(jnp.float32), (1, g))  # (1, G)
    b_t = jnp.tile(bias.reshape(1, C).astype(jnp.float32), (1, g))

    cost = pl.CostEstimate(
        flops=int(7 * M * C + 8 * Mp * G * 128),
        transcendentals=int(M),
        bytes_accessed=int(2 * M * C * itemsize + 8 * G + 4 * G * 128),
    )

    out = pl.pallas_call(
        functools.partial(_ln_channels_last_packed_kernel,
                          eps=float(eps), inv_c=float(1.0 / C)),
        out_shape=jax.ShapeDtypeStruct((Mp, G), x.dtype),
        grid_spec=pltpu.PrefetchScalarGridSpec(
            num_scalar_prefetch=0,
            grid=grid,
            in_specs=[
                pl.BlockSpec((TM, G), lambda i: (i, 0)),
                pl.BlockSpec((1, G), lambda i: (0, 0)),    # resident in VMEM
                pl.BlockSpec((1, G), lambda i: (0, 0)),
                pl.BlockSpec((G, 128), lambda i: (0, 0)),  # resident segment matrix
            ],
            out_specs=pl.BlockSpec((TM, G), lambda i: (i, 0)),
        ),
        compiler_params=pltpu.CompilerParams(
            dimension_semantics=("parallel",),
            vmem_limit_bytes=_VMEM_LIMIT_BYTES),
        cost_estimate=cost,
    )(x2, w_t, b_t, seg)
    return out.reshape(x.shape)


def layer_norm_channels_last(x, weight, bias, eps=1e-6):
    """x: (..., C); weight, bias: (C,). Standard LayerNorm over the last dim."""
    C = x.shape[-1]
    lead = x.shape[:-1]
    M = int(math.prod(lead)) if lead else 1
    # Lane-dense packing when C < 128 and divides 128 (avoids masked partial stores).
    g = 128 // C if (C < 128 and 128 % C == 0) else 1
    if g > 1 and M % g == 0:
        return _layer_norm_channels_last_packed(x, weight, bias, eps, M, C, g)
    return _layer_norm_channels_last_plain(x, weight, bias, eps, M, C)


def layer_norm(x, weight, bias, eps=1e-6, data_format="channels_last"):
    """Matches LayerNorm.forward from CVHSSR_deconv_arch.py."""
    if data_format == "channels_last":
        return layer_norm_channels_last(x, weight, bias, eps)
    elif data_format == "channels_first":
        return layer_norm_channels_first(x, weight, bias, eps)
    raise NotImplementedError(data_format)


# -----------------------------------------------------------------------------
# Pure-JAX references (bit-for-bit with the PyTorch module's math)
# -----------------------------------------------------------------------------

def _ref_channels_first(x, w, b, eps):
    u = jnp.mean(x, axis=1, keepdims=True)
    s = jnp.mean((x - u) ** 2, axis=1, keepdims=True)
    xn = (x - u) / jnp.sqrt(s + eps)
    return w[None, :, None, None] * xn + b[None, :, None, None]


def _ref_channels_last(x, w, b, eps):
    u = jnp.mean(x, axis=-1, keepdims=True)
    s = jnp.mean((x - u) ** 2, axis=-1, keepdims=True)
    xn = (x - u) / jnp.sqrt(s + eps)
    return xn * w + b


# -----------------------------------------------------------------------------
# Demo / self-test
# -----------------------------------------------------------------------------

if __name__ == "__main__":
    key = jax.random.PRNGKey(0)
    k1, k2, k3, k4, k5 = jax.random.split(key, 5)

    eps = 1e-6
    N, C, H, W = 2, 64, 16, 16

    # Non-trivial affine params (module init is ones/zeros; randomize for a real test).
    weight = 1.0 + 0.1 * jax.random.normal(k2, (C,), dtype=jnp.float32)
    bias = 0.1 * jax.random.normal(k3, (C,), dtype=jnp.float32)

    # channels_first: (N, C, H, W)
    x_cf = jax.random.normal(k1, (N, C, H, W), dtype=jnp.float32)
    out_cf = layer_norm(x_cf, weight, bias, eps, data_format="channels_first")
    jax.block_until_ready(out_cf)
    ref_cf = _ref_channels_first(x_cf, weight, bias, eps)
    assert out_cf.shape == x_cf.shape
    assert jnp.allclose(out_cf, ref_cf, atol=1e-4, rtol=1e-4)

    # channels_last, C < 128 -> lane-dense packed path
    x_cl = jax.random.normal(k4, (N, H, W, C), dtype=jnp.float32)
    out_cl = layer_norm(x_cl, weight, bias, eps, data_format="channels_last")
    jax.block_until_ready(out_cl)
    ref_cl = _ref_channels_last(x_cl, weight, bias, eps)
    assert out_cl.shape == x_cl.shape
    assert jnp.allclose(out_cl, ref_cl, atol=1e-4, rtol=1e-4)

    # channels_last, C = 128 -> plain path
    C2 = 128
    w2 = 1.0 + 0.1 * jax.random.normal(k2, (C2,), dtype=jnp.float32)
    b2 = 0.1 * jax.random.normal(k3, (C2,), dtype=jnp.float32)
    x_cl2 = jax.random.normal(k5, (2, 8, 8, C2), dtype=jnp.float32)
    out_cl2 = layer_norm(x_cl2, w2, b2, eps, data_format="channels_last")
    jax.block_until_ready(out_cl2)
    ref_cl2 = _ref_channels_last(x_cl2, w2, b2, eps)
    assert out_cl2.shape == x_cl2.shape
    assert jnp.allclose(out_cl2, ref_cl2, atol=1e-4, rtol=1e-4)

    print("KERNEL_OK")
</pallas_src>

<mosaic_0001>
module attributes {stable_mosaic.version = 11 : i64} {
  func.func @_ln_channels_first_kernel(%arg0: i32, %arg1: i32, %arg2: memref<1x64x256xf32, #tpu.memory_space<vmem>>, %arg3: memref<64x1xf32, #tpu.memory_space<vmem>>, %arg4: memref<64x1xf32, #tpu.memory_space<vmem>>, %arg5: memref<1x64x256xf32, #tpu.memory_space<vmem>>) attributes {dimension_semantics = [#tpu.dimension_semantics<parallel>, #tpu.dimension_semantics<parallel>], iteration_bounds = array<i64: 2, 1>, scalar_prefetch = 0 : i64, scratch_operands = 0 : i64, tpu.core_type = #tpu.core_type<tc>, window_params = [{transform_indices = @transform_0, window_bounds = array<i64: 1, 64, 256>}, {pipeline_mode = #tpu.pipeline_mode<synchronous>, transform_indices = @transform_1, window_bounds = array<i64: 64, 1>}, {pipeline_mode = #tpu.pipeline_mode<synchronous>, transform_indices = @transform_2, window_bounds = array<i64: 64, 1>}, {transform_indices = @transform_3, window_bounds = array<i64: 1, 64, 256>}]} {
    %c0 = arith.constant 0 : index
    %c0_0 = arith.constant 0 : index
    %c0_1 = arith.constant 0 : index
    %0 = vector.load %arg2[%c0, %c0_0, %c0_1] : memref<1x64x256xf32, #tpu.memory_space<vmem>>, vector<1x64x256xf32>
    %cst = arith.constant dense<0.000000e+00> : vector<1x256xf32>
    %1 = vector.multi_reduction <add>, %0, %cst [1] : vector<1x64x256xf32> to vector<1x256xf32>
    %2 = vector.shape_cast %1 : vector<1x256xf32> to vector<1x1x256xf32>
    %cst_2 = arith.constant 6.400000e+01 : f32
    %3 = vector.broadcast %cst_2 : f32 to vector<1x1x256xf32>
    %4 = arith.divf %2, %3 : vector<1x1x256xf32>
    %5 = vector.broadcast %4 : vector<1x1x256xf32> to vector<1x64x256xf32>
    %6 = arith.subf %0, %5 : vector<1x64x256xf32>
    %7 = arith.mulf %6, %6 : vector<1x64x256xf32>
    %cst_3 = arith.constant dense<0.000000e+00> : vector<1x256xf32>
    %8 = vector.multi_reduction <add>, %7, %cst_3 [1] : vector<1x64x256xf32> to vector<1x256xf32>
    %9 = vector.shape_cast %8 : vector<1x256xf32> to vector<1x1x256xf32>
    %cst_4 = arith.constant 6.400000e+01 : f32
    %10 = vector.broadcast %cst_4 : f32 to vector<1x1x256xf32>
    %11 = arith.divf %9, %10 : vector<1x1x256xf32>
    %cst_5 = arith.constant 9.99999997E-7 : f32
    %12 = vector.broadcast %cst_5 : f32 to vector<1x1x256xf32>
    %13 = arith.addf %11, %12 : vector<1x1x256xf32>
    %14 = math.rsqrt %13 : vector<1x1x256xf32>
    %c0_6 = arith.constant 0 : index
    %c0_7 = arith.constant 0 : index
    %15 = vector.load %arg3[%c0_6, %c0_7] : memref<64x1xf32, #tpu.memory_space<vmem>>, vector<64x1xf32>
    %16 = vector.shape_cast %15 : vector<64x1xf32> to vector<1x64x1xf32>
    %c0_8 = arith.constant 0 : index
    %c0_9 = arith.constant 0 : index
    %17 = vector.load %arg4[%c0_8, %c0_9] : memref<64x1xf32, #tpu.memory_space<vmem>>, vector<64x1xf32>
    %18 = vector.shape_cast %17 : vector<64x1xf32> to vector<1x64x1xf32>
    %19 = vector.broadcast %14 : vector<1x1x256xf32> to vector<1x64x256xf32>
    %20 = arith.mulf %6, %19 : vector<1x64x256xf32>
    %21 = vector.broadcast %16 : vector<1x64x1xf32> to vector<1x64x256xf32>
    %22 = arith.mulf %20, %21 : vector<1x64x256xf32>
    %23 = vector.broadcast %18 : vector<1x64x1xf32> to vector<1x64x256xf32>
    %24 = arith.addf %22, %23 : vector<1x64x256xf32>
    %c0_10 = arith.constant 0 : index
    %c0_11 = arith.constant 0 : index
    %c0_12 = arith.constant 0 : index
    %25 = vector.load %arg5[%c0_10, %c0_11, %c0_12] : memref<1x64x256xf32, #tpu.memory_space<vmem>>, vector<1x64x256xf32>
    tpu.vector_store %arg5[%c0_10, %c0_11, %c0_12], %24 {strides = array<i32>} : memref<1x64x256xf32, #tpu.memory_space<vmem>>, vector<1x64x256xf32>,
    return
  }
  func.func @transform_0(%arg0: i32, %arg1: i32) -> (i32, i32, i32) {
    %c0_i32 = arith.constant 0 : i32
    %c0_i32_0 = arith.constant 0 : i32
    return %arg0, %c0_i32, %arg1 : i32, i32, i32
  }
  func.func @transform_1(%arg0: i32, %arg1: i32) -> (i32, i32) {
    %c0_i32 = arith.constant 0 : i32
    %c0_i32_0 = arith.constant 0 : i32
    %c0_i32_1 = arith.constant 0 : i32
    return %c0_i32, %c0_i32_0 : i32, i32
  }
  func.func @transform_2(%arg0: i32, %arg1: i32) -> (i32, i32) {
    %c0_i32 = arith.constant 0 : i32
    %c0_i32_0 = arith.constant 0 : i32
    %c0_i32_1 = arith.constant 0 : i32
    return %c0_i32, %c0_i32_0 : i32, i32
  }
  func.func @transform_3(%arg0: i32, %arg1: i32) -> (i32, i32, i32) {
    %c0_i32 = arith.constant 0 : i32
    %c0_i32_0 = arith.constant 0 : i32
    return %arg0, %c0_i32, %arg1 : i32, i32, i32
  }
}

</mosaic_0001>

<bundles_post_ra>
// kernel: tpu_custom_call.1
= control target key start
LH: loop header
LB: loop body
LE: loop exit
PB: predicated region body
PF: predicated region fallthrough
CT: control target
= control target key end

     0   :  { %8 = vsyncpa [#allocation3], 0  ;;  %s1204_s0 = inlined_call_operand.hbm [shape: f32[2,64,256], index: 0, kind: input, shape index: {}]   ;;  %s1205_s1 = inlined_call_operand.vmem [shape: f32[64,1], index: 1, kind: input, shape index: {}]   ;;  %s1206_s2 = inlined_call_operand.vmem [shape: f32[64,1], index: 2, kind: input, shape index: {}]   ;;  %s1207_s3 = inlined_call_operand.hbm [shape: f32[2,64,256], index: 3, kind: output, shape index: {}]  }
   0x1   :  { %10 = vsyncpa [#allocation3 + $0x1], 0 }
   0x2   :  { %11 = vsyncpa [#allocation4], 0 }
   0x3   :  { %13 = vsyncpa [#allocation4 + $0x1], 0  ;;  %s812_s12 = smov 0   ;;  %s814_s13 = smov 0  }
   0x4   :  { %s816_s14 = smov 0   ;;  %s818_s15 = smov 0  }
   0x5   :  { %s820_s16 = smov 0   ;;  %s822_s17 = smov 0  }
   0x6 LB: > { %s581_s18 = sadd.s32 4294967295, %s783_s17   ;;  %s582_s19 = sadd.s32 4294967294, %s783_s17   ;;  %s783_s17 = sphi %s822_s17, %s19_s17   ;;  %s779_s16 = sphi %s820_s16, %s1222_s16   ;;  %s775_s15 = sphi %s818_s15, %s1221_s15   ;;  %s771_s14 = sphi %s816_s14, %s1220_s14   ;;  %s767_s13 = sphi %s814_s13, %s1219_s13   ;;  %s763_s12 = sphi %s812_s12, %s1218_s12  }
   0x7   : > { %s31_s20 = sadd.s32 1, %s779_s16  ;;  %s40_s21 = sadd.s32 1, %s771_s14 }
   0x8   : > { %p33_p0 = scmp.ge.s32.totalorder %s31_s20, 2  ;;  %p47_p1 = scmp.ne.s32.totalorder %s771_s14, %s767_s13 }
   0x9   : > { %p48_p2 = scmp.eq.s32.totalorder %s783_s17, 0  ;;  %p53_p3 = scmp.ne.s32.totalorder %s767_s13, %s763_s12 }
   0xa   : > { %s1224_s20 = smov (%p33_p0, %s31_s20), 0  ;;  %p54_p5 = scmp.eq.s32.totalorder %s581_s18, 0 }
   0xb   : > { %p853_p4 = por %p48_p2, %p47_p1  ;;  %s35_s23 = ssub.s32 %s779_s16, %s1224_s20 }
   0xc   : > { %p121_p6 = scmp.eq.s32.totalorder %s581_s18, 1  ;;  %p38_p7 = scmp.eq.s32.totalorder %s35_s23, 0 }
   0xd   : > { %p859_p8 = por %p54_p5, %p53_p3  ;;  %p127_p10 = scmp.eq.s32.totalorder %s582_s19, 1 }
   0xe   : > { %p863_p9 = por %p121_p6, %p47_p1  ;;  %p610_p13 = scmp.lt.s32.totalorder %s783_s17, 2 }
   0xf   : > { %s868_s26 = scalar_select %p38_p7, %s771_s14, %s40_s21  }
  0x10   : > { %s1211_s25 = scalar_select %p863_p9, 1, 0 }
  0x11   : > { %p870_p11 = por %p127_p10, %p53_p3  ;;  %s153_s28 = sand.u32 1, %s771_s14  }
  0x12   : > { %s585_s29 = sshll.u32 %s153_s28, 7  ;;  %s596_s30 = sshll.u32 %s779_s16, 11 }
  0x13   : > { %s1212_s27 = scalar_select %p870_p11, 1, 0 }
  0x14   : > { %s881_s6 = scalar_lea.hbm %s1204_s0, %s596_s30  ;;  %s157_s7 = scalar_lea.vmem [#allocation2], %s585_s29 }
  0x15   : > { %s166_s8 = sshll.u32 %s157_s7, 4  ;;  %p887_p0 = pnand %p610_p13, %p853_p4  ;;  %s883_s8 = int_to_ptr.vmem [resolvable:$true] %s166_s8 }
  0x16   : > { %s892_s10 = scalar_lea.sflag [#allocation3], %s153_s28  ;;  %s671_s11 = scalar_lea.hbm %s881_s6, 2048 }
  0x17   : > { %p672_p2 = scmp.ne.s32.totalorder %s881_s6, %s671_s11  ;;  %p673_p3 = pneg %p887_p0 }
  0x18   : > { %s676_s21 = scalar_lea.hbm %s1204_s0, 4096  ;;  %p677_p4 = scmp.lt.u32.totalorder %s881_s6, %s1204_s0 }
  0x19   : > { %p674_p5 = pnand %p673_p3, %p672_p2  ;;  %p678_p7 = scmp.lt.u32.totalorder %s676_s21, %s671_s11 }
  0x1a   : > { %p680_p13 = scmp.lt.u32.totalorder %s671_s11, %s881_s6 }
  0x1b   : > { %p675_p6 = pneg %p674_p5  ;;  %p679_p10 = por %p678_p7, %p677_p4 }
  0x1d   : > { %p681_p12 = por %p680_p13, %p679_p10 }
  0x1f   : > { %p682_p1 = pnand %p681_p12, %p675_p6 }
  0x21   : > { %685 = shalt.err (!%p682_p1)
}
  0x22   : > { %s686_s28 = scalar_lea.vmem %s883_s8, 2048  ;;  %s785_s29 = smov [#allocation2]  }
  0x23   : > { %p687_p2 = scmp.ne.s32.totalorder %s883_s8, %s686_s28  ;;  %s691_s30 = sshll.u32 %s785_s29, 4  ;;  %s692_s30 = int_to_ptr.vmem [resolvable:$false] %s691_s30 }
  0x24   : > { %s693_s4 = scalar_lea.vmem %s692_s30, 4096  ;;  %p694_p9 = scmp.lt.s32.totalorder %s883_s8, %s692_s30 }
  0x25   : > { %p689_p5 = pnand %p687_p2, %p673_p3  ;;  %p695_p4 = scmp.lt.s32.totalorder %s693_s4, %s686_s28 }
  0x27   : > { %p690_p11 = pneg %p689_p5  ;;  %p696_p7 = por %p695_p4, %p694_p9 }
  0x29   : > { %p697_p10 = pnand %p696_p7, %p690_p11 }
  0x2b   : > { %700 = shalt.err (!%p697_p10)
}
  0x2c   : > { %s786_s5 = smov 256   ;;  %s787_s7 = smov 16  }
  0x2d   : > { %605 = dma.hbm_to_vmem [thread:$0]  (!%p887_p0), %s881_s6, 2048, %s883_s8, %s892_s10, %s786_s5, %s786_s5, %s787_s7  }
  0x2e   : > { %p174_p12 = scmp.lt.s32.totalorder %s783_s17, 3  ;;  %p1214_p1 = scmp.ge.s32.totalorder %s783_s17, 1 }
  0x30   : > { %p175_p3 = pnand %p1214_p1, %p174_p12 }
  0x31   : > { %s924_s11 = sand.u32 (!%p175_p3), 1, %s767_s13  }
  0x32   : > { %178 = sbr.rel (%p175_p3) target bundleno = 234 (0xea), region = 32  ;;  %s589_s18 = sshll.u32 (!%p175_p3), %s924_s11, 7 }
  0x33   : > { %s181_s19 = scalar_lea.sflag (!%p175_p3), [#allocation3], %s924_s11  ;;  %s930_s21 = scalar_lea.vmem (!%p175_p3), [#allocation2], %s589_s18 }
  0x39   : > { %754 = dma.done.wait (%p859_p8), %s181_s19, 2048  }
  0x3a   : > { %756 = vsyncadd (%p859_p8), %s181_s19, 4294965248  ;;  %v788_v0 = vmov 0   ;;  %v320_v1 = vld [vmem:[%s1205_s1 + $0x10] sm:$0xff]  ;;  %v318_v2 = vld [vmem:[%s1205_s1] sm:$0xff]  ;;  %s479_s28 = scalar_lea.sflag [#allocation4], %s924_s11  ;;  %p1215_p9 = scmp.ne.s32.totalorder %s1211_s25, 0 }
  0x3b   : > { %666 = vset.pattern.permute.xlu1 %v788_v0  ;;  %665 = vset.pattern.permute.xlu0 %v788_v0  ;;  %v321_v3 = vld [vmem:[%s1205_s1 + $0x18] sm:$0xff]  ;;  %v319_v4 = vld [vmem:[%s1205_s1 + $0x8] sm:$0xff]  ;;  %v322_v6 = vld [vmem:[%s1205_s1 + $0x20] sm:$0xff]  ;;  %s789_s30 = smov [#allocation5]  }
  0x3c   : > { %362 = vperm.xlu1 %666, %v320_v1   ;;  %352 = vperm.xlu0 %665, %v318_v2   ;;  %v323_v5 = vld [vmem:[%s1205_s1 + $0x28] sm:$0xff]  ;;  %v955_v7 = vld [vmem:[%s930_s21] sm:$0xff]  ;;  %v961_v9 = vld [vmem:[%s930_s21 + $0x10] sm:$0xff]  ;;  %s705_s4 = sshll.u32 %s789_s30, 4  ;;  %s706_s4 = int_to_ptr.vmem [resolvable:$false] %s705_s4 }
  0x3d   : > { %v958_v8 = vld [vmem:[%s930_s21 + $0x8] sm:$0xff]  ;;  %v964_v10 = vld [vmem:[%s930_s21 + $0x18] sm:$0xff]  ;;  %v967_v11 = vld [vmem:[%s930_s21 + $0x20] sm:$0xff]  ;;  %v225_v13 = vadd.f32 %v961_v9, %v955_v7  ;;  %s707_s5 = scalar_lea.vmem %s706_s4, 4096 }
  0x3e   : > { %v970_v12 = vld [vmem:[%s930_s21 + $0x28] sm:$0xff]  ;;  %v238_v14 = vadd.f32 %v964_v10, %v958_v8  ;;  %v977_v15 = vld [vmem:[%s930_s21 + $0x30] sm:$0xff]  ;;  %v980_v16 = vld [vmem:[%s930_s21 + $0x38] sm:$0xff] }
  0x3f   : > { %v226_v17 = vadd.f32 %v225_v13, %v967_v11  ;;  %v325_v19 = vld [vmem:[%s1205_s1 + $0x38] sm:$0xff]  ;;  %v324_v20 = vld [vmem:[%s1205_s1 + $0x30] sm:$0xff]  ;;  %v991_v21 = vld [vmem:[%s930_s21 + $0x40] sm:$0xff] }
  0x40   : > { %367 = vperm.xlu1 %666, %v321_v3   ;;  %357 = vperm.xlu0 %665, %v319_v4   ;;  %v239_v18 = vadd.f32 %v238_v14, %v970_v12  ;;  %v994_v22 = vld [vmem:[%s930_s21 + $0x48] sm:$0xff]  ;;  %v326_v27 = vld [vmem:[%s1206_s2] sm:$0xff]  ;;  %v1006_v28 = vld [vmem:[%s930_s21 + $0x50] sm:$0xff] }
  0x41   : > { %v227_v23 = vadd.f32 %v226_v17, %v977_v15  ;;  %v327_v26 = vld [vmem:[%s1206_s2 + $0x8] sm:$0xff]  ;;  %v1010_v30 = vld [vmem:[%s930_s21 + $0x58] sm:$0xff]  ;;  %v328_v33 = vld [vmem:[%s1206_s2 + $0x10] sm:$0xff] }
  0x42   : > { %v240_v24 = vadd.f32 %v239_v18, %v980_v16  ;;  %v329_v32 = vld [vmem:[%s1206_s2 + $0x18] sm:$0xff]  ;;  %v221_v34 = vld [vmem:[%s930_s21 + $0x60] sm:$0xff]  ;;  %v222_v36 = vld [vmem:[%s930_s21 + $0x68] sm:$0xff] }
  0x43   : > { %v228_v25 = vadd.f32 %v227_v23, %v991_v21  ;;  %v331_v38 = vld [vmem:[%s1206_s2 + $0x28] sm:$0xff]  ;;  %v330_v39 = vld [vmem:[%s1206_s2 + $0x20] sm:$0xff]  ;;  %v223_v40 = vld [vmem:[%s930_s21 + $0x70] sm:$0xff] }
  0x44   : > { %377 = vperm.xlu1 %666, %v323_v5   ;;  %372 = vperm.xlu0 %665, %v322_v6   ;;  %v241_v29 = vadd.f32 %v240_v24, %v994_v22  ;;  %v224_v42 = vld [vmem:[%s930_s21 + $0x78] sm:$0xff]  ;;  %v332_v45 = vld [vmem:[%s1206_s2 + $0x30] sm:$0xff]  ;;  %s1126_s21 = scalar_lea.vmem [#allocation5], %s589_s18  ;;  %s597_s18 = sshll.u32 %s775_s15, 11 }
  0x45   : > { %v229_v31 = vadd.f32 %v228_v25, %v1006_v28  ;;  %v333_v44 = vld [vmem:[%s1206_s2 + $0x38] sm:$0xff]  ;;  %s494_s24 = sshll.u32 %s1126_s21, 4  ;;  %s1149_s15 = scalar_lea.hbm %s1207_s3, %s597_s18  ;;  %s1151_s24 = int_to_ptr.vmem [resolvable:$true] %s494_s24 }
  0x46   : > { %v242_v35 = vadd.f32 %v241_v29, %v1010_v30  ;;  %s701_s29 = scalar_lea.vmem %s1151_s24, 2048  ;;  %p708_p6 = scmp.lt.s32.totalorder %s1151_s24, %s706_s4 }
  0x47   : > { %v230_v37 = vadd.f32 %v229_v31, %v221_v34  ;;  %p702_p8 = scmp.ne.s32.totalorder %s1151_s24, %s701_s29  ;;  %p709_p13 = scmp.lt.s32.totalorder %s707_s5, %s701_s29 }
  0x48   : > { %387 = vperm.xlu1 %666, %v325_v19   ;;  %382 = vperm.xlu0 %665, %v324_v20   ;;  %v243_v41 = vadd.f32 %v242_v35, %v222_v36 }
  0x49   : > { %v231_v43 = vadd.f32 %v230_v37, %v223_v40  ;;  %p703_p11 = pnand %p702_p8, %p1215_p9  ;;  %p710_p2 = por %p709_p13, %p708_p6 }
  0x4a   : > { %v244_v46 = vadd.f32 %v243_v41, %v224_v42 }
  0x4b   : > { %v232_v47 = vrot.slane %v231_v43, 4  ;;  %p704_p0 = pneg %p703_p11 }
  0x4c   : > { %413 = vperm.xlu1 %666, %v327_v26   ;;  %408 = vperm.xlu0 %665, %v326_v27   ;;  %v245_v48 = vrot.slane %v244_v46, 4 }
  0x4d   : > { %v233_v49 = vadd.f32 %v232_v47, %v231_v43  ;;  %p711_p5 = pnand %p710_p2, %p704_p0 }
  0x4e   : > { %v246_v50 = vadd.f32 %v245_v48, %v244_v46 }
  0x4f   : > { %v234_v51 = vrot.slane %v233_v49, 2 }
  0x50   : > { %423 = vperm.xlu1 %666, %v329_v32   ;;  %418 = vperm.xlu0 %665, %v328_v33   ;;  %v247_v52 = vrot.slane %v246_v50, 2 }
  0x51   : > { %v235_v53 = vadd.f32 %v234_v51, %v233_v49 }
  0x52   : > { %v248_v54 = vadd.f32 %v247_v52, %v246_v50 }
  0x53   : > { %v236_v55 = vrot.slane %v235_v53, 1 }
  0x54   : > { %433 = vperm.xlu1 %666, %v331_v38   ;;  %428 = vperm.xlu0 %665, %v330_v39   ;;  %v249_v56 = vrot.slane %v248_v54, 1 }
  0x55   : > { %v237_v57 = vadd.f32 %v236_v55, %v235_v53 }
  0x56   : > { %v250_v58 = vadd.f32 %v249_v56, %v248_v54 }
  0x57   : > { %v252_v59 = vmul.f32 0.015625, %v237_v57 }
  0x58   : > { %443 = vperm.xlu1 %666, %v333_v44   ;;  %438 = vperm.xlu0 %665, %v332_v45   ;;  %v253_v60 = vmul.f32 0.015625, %v250_v58 }
  0x59   : > { %v1037_v61 = vsub.f32 %v955_v7, %v252_v59  ;;  %v1040_v62 = vsub.f32 %v961_v9, %v252_v59  ;;  %v1049_v1 = vsub.f32 %v967_v11, %v252_v59  ;;  %v1063_v7 = vsub.f32 %v977_v15, %v252_v59 }
  0x5a   : > { %v1043_v63 = vsub.f32 %v958_v8, %v253_v60  ;;  %v1046_v0 = vsub.f32 %v964_v10, %v253_v60  ;;  %v1056_v4 = vsub.f32 %v970_v12, %v253_v60  ;;  %v1068_v10 = vsub.f32 %v980_v16, %v253_v60 }
  0x5b   : > { %v270_v2 = vmul.f32 %v1037_v61, %v1037_v61  ;;  %v272_v3 = vmul.f32 %v1040_v62, %v1040_v62  ;;  %v274_v8 = vmul.f32 %v1049_v1, %v1049_v1  ;;  %v1073_v13 = vsub.f32 %v991_v21, %v252_v59 }
  0x5c   : > { %v271_v5 = vmul.f32 %v1043_v63, %v1043_v63  ;;  %v273_v6 = vmul.f32 %v1046_v0, %v1046_v0  ;;  %v275_v11 = vmul.f32 %v1056_v4, %v1056_v4  ;;  %v276_v14 = vmul.f32 %v1063_v7, %v1063_v7 }
  0x5d   : > { %v286_v9 = vadd.f32 %v272_v3, %v270_v2  ;;  %v1078_v15 = vsub.f32 %v994_v22, %v253_v60  ;;  %v277_v18 = vmul.f32 %v1068_v10, %v1068_v10  ;;  %v1083_v16 = vsub.f32 %v1006_v28, %v252_v59 }
  0x5e   : > { %v299_v12 = vadd.f32 %v273_v6, %v271_v5  ;;  %v278_v20 = vmul.f32 %v1073_v13, %v1073_v13  ;;  %v1088_v21 = vsub.f32 %v1010_v30, %v253_v60  ;;  %v1092_v22 = vsub.f32 %v221_v34, %v252_v59 }
  0x5f   : > { %v287_v17 = vadd.f32 %v286_v9, %v274_v8  ;;  %v279_v24 = vmul.f32 %v1078_v15, %v1078_v15  ;;  %v280_v26 = vmul.f32 %v1083_v16, %v1083_v16  ;;  %v1096_v29 = vsub.f32 %v222_v36, %v253_v60 }
  0x60   : > { %v300_v19 = vadd.f32 %v299_v12, %v275_v11  ;;  %v281_v28 = vmul.f32 %v1088_v21, %v1088_v21  ;;  %v1100_v32 = vsub.f32 %v223_v40, %v252_v59  ;;  %v282_v30 = vmul.f32 %v1092_v22, %v1092_v22 }
  0x61   : > { %v288_v23 = vadd.f32 %v287_v17, %v276_v14  ;;  %v1104_v35 = vsub.f32 %v224_v42, %v253_v60  ;;  %v283_v34 = vmul.f32 %v1096_v29, %v1096_v29 }
  0x62   : > { %v301_v25 = vadd.f32 %v300_v19, %v277_v18  ;;  %v284_v36 = vmul.f32 %v1100_v32, %v1100_v32 }
  0x63   : > { %v289_v27 = vadd.f32 %v288_v23, %v278_v20  ;;  %v285_v39 = vmul.f32 %v1104_v35, %v1104_v35 }
  0x64   : > { %v302_v31 = vadd.f32 %v301_v25, %v279_v24 }
  0x65   : > { %v290_v33 = vadd.f32 %v289_v27, %v280_v26 }
  0x66   : > { %v303_v37 = vadd.f32 %v302_v31, %v281_v28 }
  0x67   : > { %v291_v38 = vadd.f32 %v290_v33, %v282_v30 }
  0x68   : > { %v304_v41 = vadd.f32 %v303_v37, %v283_v34 }
  0x69   : > { %v292_v40 = vadd.f32 %v291_v38, %v284_v36 }
  0x6a   : > { %v305_v43 = vadd.f32 %v304_v41, %v285_v39 }
  0x6b   : > { %v293_v44 = vrot.slane %v292_v40, 4 }
  0x6c   : > { %v306_v45 = vrot.slane %v305_v43, 4 }
  0x6d   : > { %v294_v46 = vadd.f32 %v293_v44, %v292_v40 }
  0x6e   : > { %v307_v47 = vadd.f32 %v306_v45, %v305_v43 }
  0x6f   : > { %v295_v42 = vrot.slane %v294_v46, 2 }
  0x70   : > { %v308_v48 = vrot.slane %v307_v47, 2 }
  0x71   : > { %v296_v49 = vadd.f32 %v295_v42, %v294_v46 }
  0x72   : > { %v309_v50 = vadd.f32 %v308_v48, %v307_v47 }
  0x73   : > { %v297_v51 = vrot.slane %v296_v49, 1 }
  0x74   : > { %v310_v52 = vrot.slane %v309_v50, 1 }
  0x75   : > { %v298_v53 = vadd.f32 %v297_v51, %v296_v49 }
  0x76   : > { %v311_v54 = vadd.f32 %v310_v52, %v309_v50 }
  0x77   : > { %v312_v55 = vmul.f32 0.015625, %v298_v53 }
  0x78   : > { %v313_v56 = vmul.f32 0.015625, %v311_v54 }
  0x79   : > { %v314_v57 = vadd.f32 1e-06, %v312_v55 }
  0x7a   : > { %v315_v58 = vadd.f32 1e-06, %v313_v56 }
  0x7b   : > { %667 = vrsqrt.f32 %v314_v57 }
  0x7c   : > { %669 = vrsqrt.f32 %v315_v58 }
  0x85   : > { %v668_v5 = vpop.eup %667 }
  0x86   : > { %v670_v6 = vpop.eup %669  ;;  %v334_v11 = vmul.f32 %v668_v5, %v1037_v61  ;;  %v336_v14 = vmul.f32 %v668_v5, %v1040_v62  ;;  %v338_v20 = vmul.f32 %v668_v5, %v1049_v1  ;;  %v340_v24 = vmul.f32 %v668_v5, %v1063_v7 }
  0x87   : > { %v335_v12 = vmul.f32 %v670_v6, %v1043_v63  ;;  %v337_v17 = vmul.f32 %v670_v6, %v1046_v0  ;;  %v339_v23 = vmul.f32 %v670_v6, %v1056_v4  ;;  %v341_v25 = vmul.f32 %v670_v6, %v1068_v10 }
  0x88   : > { %v344_v34 = vmul.f32 %v668_v5, %v1083_v16  ;;  %v345_v1 = vmul.f32 %v670_v6, %v1088_v21  ;;  %v342_v4 = vmul.f32 %v668_v5, %v1073_v13  ;;  %v343_v7 = vmul.f32 %v670_v6, %v1078_v15 }
  0x89   : > { %v348_v40 = vmul.f32 %v668_v5, %v1100_v32  ;;  %v349_v43 = vmul.f32 %v670_v6, %v1104_v35  ;;  %v346_v44 = vmul.f32 %v668_v5, %v1092_v22  ;;  %v347_v45 = vmul.f32 %v670_v6, %v1096_v29 }
  0xbb   : > { %v363_v59 = vpop.permute.xlu1 %362  ;;  %v353_v60 = vpop.permute.xlu0 %352 }
  0xbc   : > { %v390_v26 = vmul.f32 %v353_v60, %v334_v11  ;;  %v391_v27 = vmul.f32 %v353_v60, %v335_v12  ;;  %v394_v10 = vmul.f32 %v363_v59, %v338_v20  ;;  %v395_v37 = vmul.f32 %v363_v59, %v339_v23 }
  0xbf   : > { %v368_v2 = vpop.permute.xlu1 %367  ;;  %v358_v3 = vpop.permute.xlu0 %357 }
  0xc0   : > { %v392_v28 = vmul.f32 %v358_v3, %v336_v14  ;;  %v393_v61 = vmul.f32 %v358_v3, %v337_v17  ;;  %v396_v36 = vmul.f32 %v368_v2, %v340_v24  ;;  %v397_v38 = vmul.f32 %v368_v2, %v341_v25 }
  0xc3   : > { %v378_v8 = vpop.permute.xlu1 %377  ;;  %v373_v9 = vpop.permute.xlu0 %372 }
  0xc4   : > { %v400_v46 = vmul.f32 %v378_v8, %v344_v34  ;;  %v401_v47 = vmul.f32 %v378_v8, %v345_v1  ;;  %v398_v42 = vmul.f32 %v373_v9, %v342_v4  ;;  %v399_v48 = vmul.f32 %v373_v9, %v343_v7 }
  0xc7   : > { %v388_v18 = vpop.permute.xlu1 %387  ;;  %v383_v19 = vpop.permute.xlu0 %382 }
  0xc8   : > { %v404_v29 = vmul.f32 %v388_v18, %v348_v40  ;;  %v405_v52 = vmul.f32 %v388_v18, %v349_v43  ;;  %v402_v53 = vmul.f32 %v383_v19, %v346_v44  ;;  %v403_v54 = vmul.f32 %v383_v19, %v347_v45 }
  0xcb   : > { %v414_v63 = vpop.permute.xlu1 %413  ;;  %v409_v31 = vpop.permute.xlu0 %408 }
  0xcc   : > { %v448_v62 = vadd.f32 %v414_v63, %v392_v28  ;;  %v449_v30 = vadd.f32 %v414_v63, %v393_v61  ;;  %v446_v0 = vadd.f32 %v409_v31, %v390_v26  ;;  %v447_v33 = vadd.f32 %v409_v31, %v391_v27 }
  0xce   : > { %464 = vst [vmem:[%s1126_s21 + $0x10] sm:$0xff] %v448_v62  ;;  %465 = vst [vmem:[%s1126_s21 + $0x18] sm:$0xff] %v449_v30 }
  0xcf   : > { %462 = vst [vmem:[%s1126_s21] sm:$0xff] %v446_v0  ;;  %463 = vst [vmem:[%s1126_s21 + $0x8] sm:$0xff] %v447_v33  ;;  %v424_v13 = vpop.permute.xlu1 %423  ;;  %v419_v15 = vpop.permute.xlu0 %418 }
  0xd0   : > { %v452_v16 = vadd.f32 %v424_v13, %v396_v36  ;;  %v453_v21 = vadd.f32 %v424_v13, %v397_v38  ;;  %v450_v39 = vadd.f32 %v419_v15, %v394_v10  ;;  %v451_v41 = vadd.f32 %v419_v15, %v395_v37 }
  0xd2   : > { %468 = vst [vmem:[%s1126_s21 + $0x30] sm:$0xff] %v452_v16  ;;  %469 = vst [vmem:[%s1126_s21 + $0x38] sm:$0xff] %v453_v21 }
  0xd3   : > { %466 = vst [vmem:[%s1126_s21 + $0x20] sm:$0xff] %v450_v39  ;;  %467 = vst [vmem:[%s1126_s21 + $0x28] sm:$0xff] %v451_v41  ;;  %v434_v32 = vpop.permute.xlu1 %433  ;;  %v429_v35 = vpop.permute.xlu0 %428 }
  0xd4   : > { %v456_v49 = vadd.f32 %v434_v32, %v400_v46  ;;  %v457_v22 = vadd.f32 %v434_v32, %v401_v47  ;;  %v454_v50 = vadd.f32 %v429_v35, %v398_v42  ;;  %v455_v51 = vadd.f32 %v429_v35, %v399_v48 }
  0xd6   : > { %472 = vst [vmem:[%s1126_s21 + $0x50] sm:$0xff] %v456_v49  ;;  %473 = vst [vmem:[%s1126_s21 + $0x58] sm:$0xff] %v457_v22 }
  0xd7   : > { %470 = vst [vmem:[%s1126_s21 + $0x40] sm:$0xff] %v454_v50  ;;  %471 = vst [vmem:[%s1126_s21 + $0x48] sm:$0xff] %v455_v51  ;;  %v444_v55 = vpop.permute.xlu1 %443  ;;  %v439_v56 = vpop.permute.xlu0 %438 }
  0xd8   : > { %v460_v57 = vadd.f32 %v444_v55, %v404_v29  ;;  %v461_v58 = vadd.f32 %v444_v55, %v405_v52  ;;  %v458_v59 = vadd.f32 %v439_v56, %v402_v53  ;;  %v459_v60 = vadd.f32 %v439_v56, %v403_v54 }
  0xda   : > { %476 = vst [vmem:[%s1126_s21 + $0x70] sm:$0xff] %v460_v57  ;;  %477 = vst [vmem:[%s1126_s21 + $0x78] sm:$0xff] %v461_v58 }
  0xdb   : > { %474 = vst [vmem:[%s1126_s21 + $0x60] sm:$0xff] %v458_v59  ;;  %475 = vst [vmem:[%s1126_s21 + $0x68] sm:$0xff] %v459_v60 }
  0xdc   : > { %714 = shalt.err (!%p711_p5)
}
  0xdd   : > { %s715_s7 = scalar_lea.hbm %s1149_s15, 2048  ;;  %s719_s8 = scalar_lea.hbm %s1207_s3, 4096 }
  0xde   : > { %p716_p4 = scmp.ne.s32.totalorder %s1149_s15, %s715_s7  ;;  %p720_p12 = scmp.lt.u32.totalorder %s1149_s15, %s1207_s3 }
  0xdf   : > { %p721_p1 = scmp.lt.u32.totalorder %s719_s8, %s715_s7  ;;  %p723_p8 = scmp.lt.u32.totalorder %s715_s7, %s1149_s15 }
  0xe0   : > { %p717_p7 = pnand %p716_p4, %p1215_p9 }
  0xe1   : > { %p722_p3 = por %p721_p1, %p720_p12 }
  0xe2   : > { %p718_p10 = pneg %p717_p7 }
  0xe3   : > { %p724_p11 = por %p723_p8, %p722_p3 }
  0xe5   : > { %p725_p0 = pnand %p724_p11, %p718_p10 }
  0xe7   : > { %728 = shalt.err (!%p725_p0)
}
  0xe8   : > { %s790_s21 = smov 256   ;;  %s791_s18 = smov 16  }
  0xe9   : > { %600 = dma.vmem_to_hbm [thread:$0]  (%p1215_p9), %s1151_s24, 2048, %s1149_s15, %s479_s28, %s790_s21, %s790_s21, %s791_s18  }
  0xea PF: > { %s509_s22 = sand.u32 1, %s763_s12   ;;  %p1216_p6 = scmp.ne.s32.totalorder %s1212_s27, 0 }
  0xeb   : > { %p1217_p13 = scmp.ge.s32.totalorder %s783_s17, 2  ;;  %s510_s23 = scalar_lea.sflag [#allocation4], %s509_s22 }
  0xed   : > { %p607_p2 = pnand %p1217_p13, %p1216_p6 }
  0xef   : > { %758 = dma.done.wait (!%p607_p2), %s510_s23, 2048  }
  0xf0   : > { %760 = vsyncadd (!%p607_p2), %s510_s23, 4294965248  ;;  %s19_s17 = sadd.s32 1, %s783_s17   ;;  %s1218_s12 = smov %s767_s13 }
  0xf1   : > { %p16_p5 = scmp.ge.s32.totalorder %s19_s17, 4   ;;  %s1219_s13 = smov %s771_s14 }
  0xf2   : > { %s1220_s14 = smov %s868_s26  ;;  %s1221_s15 = smov %s779_s16 }
  0xf3   : > { %s1222_s16 = smov %s1224_s20  ;;  %18 = sbr.rel (!%p16_p5) target bundleno = 6 (0x6), region = 77 }
  0xfa   :  { %515 = vsyncpa [#allocation3], 1 }
  0xfb   :  { %517 = vsyncpa [#allocation3 + $0x1], 1 }
  0xfc   :  { %518 = vsyncpa [#allocation4], 1 }
  0xfd   :  { %520 = vsyncpa [#allocation4 + $0x1], 1 }

</bundles_post_ra>
